<compile_context>
chip_gen: v7x
topology: tpu7x:2x2x1
jax: 0.10.0
libtpu: 0.0.40
codegen_flags: <defaults>
</compile_context>

<pallas_src>
import functools

import jax
import jax.numpy as jnp
from jax.experimental import pallas as pl
from jax.experimental.pallas import tpu as pltpu


def _round_up(v: int, m: int) -> int:
    return (v + m - 1) // m * m


def _gabor_kernel(x_ref, w_ref, b_ref, o_ref, *, dim_out):
    # One fused matmul on the MXU: lanes [0, dim_out) hold the (pre-scaled)
    # frequency branch, lanes [dim_out, 2*dim_out) the (pre-scaled) scale
    # branch.  Nonlinearities run on VPU/EUP, everything VMEM resident.
    z = jnp.dot(x_ref[...], w_ref[...], preferred_element_type=jnp.float32)
    z = z + b_ref[...]
    omega = z[:, :dim_out]          # already multiplied by w0 via the weights
    s = z[:, dim_out:]              # already multiplied by c via the weights
    o_ref[...] = jnp.cos(omega) * jnp.exp(-(s * s))


def real_gabor_layer(x, wf, bf, ws, bs, *, w0=30.0, c=10.0, tile_n=512):
    """x: (N, dim_in); wf/ws: (dim_in, dim_out); bf/bs: (1, dim_out) -> (N, dim_out) f32."""
    n, dim_in = x.shape
    dim_out = wf.shape[1]
    w0 = float(w0)
    c = float(c)

    # One-time parameter transform: fold the scalar gains and fuse the two
    # linear layers into a single 2*dim_out wide weight / bias.
    w_fused = jnp.concatenate([w0 * wf, c * ws], axis=1).astype(jnp.float32)
    b_fused = jnp.concatenate([w0 * bf, c * bs], axis=1).astype(jnp.float32)

    # Tile N.  Rows are zero-padded so the tile evenly divides the
    # sublane-aligned batch; padded rows are sliced off at the end.
    n_pad = _round_up(max(n, 1), 8)
    tile = min(tile_n, n_pad)
    n_pad = _round_up(n_pad, tile)
    if n_pad != n:
        x = jnp.pad(x, ((0, n_pad - n), (0, 0)))
    x = x.astype(jnp.float32)

    grid = (n_pad // tile,)

    kernel = functools.partial(_gabor_kernel, dim_out=dim_out)

    cost = pl.CostEstimate(
        flops=2 * n * dim_in * (2 * dim_out),
        transcendentals=2 * n * dim_out,  # one cos + one exp per output element
        bytes_accessed=(x.size + w_fused.size + b_fused.size + n * dim_out) * 4,
    )

    out = pl.pallas_call(
        kernel,
        out_shape=jax.ShapeDtypeStruct((n_pad, dim_out), jnp.float32),
        grid_spec=pltpu.PrefetchScalarGridSpec(
            num_scalar_prefetch=0,
            grid=grid,
            in_specs=[
                # Streamed x tile (double-buffered by the BlockSpec pipeline).
                pl.BlockSpec((tile, dim_in), lambda i: (i, 0)),
                # Weights / biases: constant index_map -> stay VMEM resident.
                pl.BlockSpec((dim_in, 2 * dim_out), lambda i: (0, 0)),
                pl.BlockSpec((1, 2 * dim_out), lambda i: (0, 0)),
            ],
            out_specs=pl.BlockSpec((tile, dim_out), lambda i: (i, 0)),
        ),
        compiler_params=pltpu.CompilerParams(
            dimension_semantics=("parallel",),
        ),
        cost_estimate=cost,
    )(x, w_fused, b_fused)

    return out[:n]


def _ref_forward(x, wf, bf, ws, bs, w0=30.0, c=10.0):
    freqs = x @ wf + bf
    scale = x @ ws + bs
    return jnp.cos(w0 * freqs) * jnp.exp(-(scale * c) ** 2)


if __name__ == "__main__":
    # Small shapes consistent with the module: a batch of 16 coordinate
    # vectors, dim_in=32, dim_out=64.
    dim_in, dim_out, n = 32, 64, 16

    key = jax.random.PRNGKey(0)
    kx, kwf, kbf, kws, kbs = jax.random.split(key, 5)

    # Deterministic init matching torch.nn.Linear defaults:
    # U(-1/sqrt(dim_in), 1/sqrt(dim_in)) for both weight and bias.
    bound = 1.0 / (dim_in ** 0.5)
    x = jax.random.normal(kx, (n, dim_in), dtype=jnp.float32)
    wf = jax.random.uniform(kwf, (dim_in, dim_out), jnp.float32, -bound, bound)
    bf = jax.random.uniform(kbf, (1, dim_out), jnp.float32, -bound, bound)
    ws = jax.random.uniform(kws, (dim_in, dim_out), jnp.float32, -bound, bound)
    bs = jax.random.uniform(kbs, (1, dim_out), jnp.float32, -bound, bound)

    out = real_gabor_layer(x, wf, bf, ws, bs, w0=30.0, c=10.0)
    out = jax.block_until_ready(out)

    ref = _ref_forward(x, wf, bf, ws, bs)
    assert out.shape == (n, dim_out), f"bad shape {out.shape}"
    assert bool(jnp.allclose(out, ref, atol=1e-4, rtol=1e-4)), "mismatch vs reference"

    print("KERNEL_OK")
</pallas_src>

<mosaic_0001>
module attributes {stable_mosaic.version = 11 : i64} {
  func.func @_gabor_kernel(%arg0: i32, %arg1: memref<16x32xf32, #tpu.memory_space<vmem>>, %arg2: memref<32x128xf32, #tpu.memory_space<vmem>>, %arg3: memref<1x128xf32, #tpu.memory_space<vmem>>, %arg4: memref<16x64xf32, #tpu.memory_space<vmem>>) attributes {dimension_semantics = [#tpu.dimension_semantics<parallel>], iteration_bounds = array<i64: 1>, scalar_prefetch = 0 : i64, scratch_operands = 0 : i64, tpu.core_type = #tpu.core_type<tc>, window_params = [{transform_indices = @transform_0, window_bounds = array<i64: 16, 32>}, {pipeline_mode = #tpu.pipeline_mode<synchronous>, transform_indices = @transform_1, window_bounds = array<i64: 32, 128>}, {pipeline_mode = #tpu.pipeline_mode<synchronous>, transform_indices = @transform_2, window_bounds = array<i64: 1, 128>}, {transform_indices = @transform_3, window_bounds = array<i64: 16, 64>}]} {
    %c0 = arith.constant 0 : index
    %c0_0 = arith.constant 0 : index
    %0 = vector.load %arg1[%c0, %c0_0] : memref<16x32xf32, #tpu.memory_space<vmem>>, vector<16x32xf32>
    %c0_1 = arith.constant 0 : index
    %c0_2 = arith.constant 0 : index
    %1 = vector.load %arg2[%c0_1, %c0_2] : memref<32x128xf32, #tpu.memory_space<vmem>>, vector<32x128xf32>
    %cst = arith.constant dense<0.000000e+00> : vector<16x128xf32>
    %2 = tpu.matmul %0, %1, %cst {dimension_numbers = #tpu.dot_dimension_numbers<[1], [0], [0], [1], [0, 0, 1, 1], [], []>} : vector<16x32xf32>, vector<32x128xf32>, vector<16x128xf32> -> vector<16x128xf32>
    %c0_3 = arith.constant 0 : index
    %c0_4 = arith.constant 0 : index
    %3 = vector.load %arg3[%c0_3, %c0_4] : memref<1x128xf32, #tpu.memory_space<vmem>>, vector<1x128xf32>
    %4 = vector.broadcast %3 : vector<1x128xf32> to vector<16x128xf32>
    %5 = arith.addf %2, %4 : vector<16x128xf32>
    %6 = vector.extract_strided_slice %5 {offsets = [0, 0], sizes = [16, 64], strides = [1, 1]} : vector<16x128xf32> to vector<16x64xf32>
    %7 = vector.extract_strided_slice %5 {offsets = [0, 64], sizes = [16, 64], strides = [1, 1]} : vector<16x128xf32> to vector<16x64xf32>
    %8 = math.cos %6 : vector<16x64xf32>
    %9 = arith.mulf %7, %7 : vector<16x64xf32>
    %cst_5 = arith.constant 0.000000e+00 : f32
    %10 = vector.broadcast %cst_5 : f32 to vector<16x64xf32>
    %11 = arith.subf %10, %9 : vector<16x64xf32>
    %12 = math.exp %11 : vector<16x64xf32>
    %13 = arith.mulf %8, %12 : vector<16x64xf32>
    %c0_6 = arith.constant 0 : index
    %c0_7 = arith.constant 0 : index
    %14 = vector.load %arg4[%c0_6, %c0_7] : memref<16x64xf32, #tpu.memory_space<vmem>>, vector<16x64xf32>
    tpu.vector_store %arg4[%c0_6, %c0_7], %13 {strides = array<i32>} : memref<16x64xf32, #tpu.memory_space<vmem>>, vector<16x64xf32>,
    return
  }
  func.func @transform_0(%arg0: i32) -> (i32, i32) {
    %c0_i32 = arith.constant 0 : i32
    %c0_i32_0 = arith.constant 0 : i32
    return %arg0, %c0_i32 : i32, i32
  }
  func.func @transform_1(%arg0: i32) -> (i32, i32) {
    %c0_i32 = arith.constant 0 : i32
    %c0_i32_0 = arith.constant 0 : i32
    %c0_i32_1 = arith.constant 0 : i32
    return %c0_i32, %c0_i32_0 : i32, i32
  }
  func.func @transform_2(%arg0: i32) -> (i32, i32) {
    %c0_i32 = arith.constant 0 : i32
    %c0_i32_0 = arith.constant 0 : i32
    %c0_i32_1 = arith.constant 0 : i32
    return %c0_i32, %c0_i32_0 : i32, i32
  }
  func.func @transform_3(%arg0: i32) -> (i32, i32) {
    %c0_i32 = arith.constant 0 : i32
    %c0_i32_0 = arith.constant 0 : i32
    return %arg0, %c0_i32 : i32, i32
  }
}

</mosaic_0001>

<bundles_post_ra>
// kernel: tpu_custom_call.1
= control target key start
LH: loop header
LB: loop body
LE: loop exit
PB: predicated region body
PF: predicated region fallthrough
CT: control target
= control target key end

     0   :  { %8 = vsyncpa [#allocation3], 0  ;;  %s709_s0 = inlined_call_operand.hbm [shape: f32[16,32], index: 0, kind: input, shape index: {}]   ;;  %s710_s1 = inlined_call_operand.hbm [shape: f32[32,128], index: 1, kind: input, shape index: {}]   ;;  %s711_s2 = inlined_call_operand.vmem [shape: f32[1,128], index: 2, kind: input, shape index: {}]   ;;  %s712_s3 = inlined_call_operand.hbm [shape: f32[16,64], index: 3, kind: output, shape index: {}]  }
   0x1   :  { %9 = vsyncpa [#allocation6], 0 }
   0x2   :  { %10 = vsyncpa [#allocation4], 0  ;;  %s523_s12 = smov [#allocation2]   ;;  %s451_s16 = scalar_lea.hbm %s709_s0, 256 }
   0x3   :  { %s16_s13 = sshll.u32 %s523_s12, 4  ;;  %p452_p0 = scmp.ne.s32.totalorder %s709_s0, %s451_s16  ;;  %s17_s13 = int_to_ptr.vmem [resolvable:$true] %s16_s13 }
   0x4   :  { %p455_p1 = scmp.lt.u32.totalorder %s451_s16, %s709_s0 }
   0x6   :  { %p457_p2 = pnand %p455_p1, %p452_p0 }
   0x8   :  { %460 = shalt.err (!%p457_p2)
}
   0x9   :  { %s461_s21 = scalar_lea.vmem %s17_s13, 256  ;;  %p466_p4 = scmp.lt.s32.totalorder %s17_s13, %s17_s13 }
   0xa   :  { %p462_p3 = scmp.ne.s32.totalorder %s17_s13, %s461_s21  ;;  %p467_p5 = scmp.lt.s32.totalorder %s461_s21, %s461_s21 }
   0xc   :  { %p468_p6 = por %p467_p5, %p466_p4 }
   0xe   :  { %p469_p7 = pnand %p468_p6, %p462_p3 }
  0x10   :  { %472 = shalt.err (!%p469_p7)
}
  0x11   :  { %s524_s22 = smov 128   ;;  %s525_s23 = smov 8  }
  0x12   :  { %22 = dma.hbm_to_vmem [thread:$0]  %s709_s0, 256, %s17_s13, [#allocation3], %s524_s22, %s524_s22, %s525_s23  }
  0x13   :  { %s526_s26 = smov [#allocation5]   ;;  %s473_s30 = scalar_lea.hbm %s710_s1, 512 }
  0x14   :  { %s28_s27 = sshll.u32 %s526_s26, 4  ;;  %p474_p8 = scmp.ne.s32.totalorder %s710_s1, %s473_s30  ;;  %s29_s27 = int_to_ptr.vmem [resolvable:$true] %s28_s27 }
  0x15   :  { %p477_p9 = scmp.lt.u32.totalorder %s473_s30, %s710_s1 }
  0x17   :  { %p479_p10 = pnand %p477_p9, %p474_p8 }
  0x19   :  { %482 = shalt.err (!%p479_p10)
}
  0x1a   :  { %s483_s8 = scalar_lea.vmem %s29_s27, 512  ;;  %p488_p12 = scmp.lt.s32.totalorder %s29_s27, %s29_s27 }
  0x1b   :  { %p484_p11 = scmp.ne.s32.totalorder %s29_s27, %s483_s8  ;;  %p489_p13 = scmp.lt.s32.totalorder %s483_s8, %s483_s8 }
  0x1d   :  { %p490_p0 = por %p489_p13, %p488_p12 }
  0x1f   :  { %p491_p1 = pnand %p490_p0, %p484_p11 }
  0x21   :  { %494 = shalt.err (!%p491_p1)
}
  0x22   :  { %34 = dma.hbm_to_vmem [thread:$0]  %s710_s1, 512, %s29_s27, [#allocation6], %s524_s22, %s524_s22, %s525_s23  }
  0x23   :  { %517 = dma.done.wait [#allocation3], 256  }
  0x24   :  { %518 = vsyncadd [#allocation3], 4294967040 }
  0x25   :  { %519 = dma.done.wait [#allocation6], 512  }
  0x26   :  { %520 = vsyncadd [#allocation6], 4294966784  ;;  %vm56_vm0 = vcmask 261120   ;;  %v45_v0 = vld [vmem:[#allocation5] sm:$0xff]  ;;  %v46_v1 = vld [vmem:[#allocation5 + $0x8] sm:$0xff]  ;;  %s534_s11 = smov [#allocation7]  }
  0x27   :  { %v47_v2 = vld [vmem:[#allocation5 + $0x10] sm:$0xff]  ;;  %v411_v3 = vpack.c.bf16 %v46_v1, %v45_v0  ;;  %v48_v4 = vld [vmem:[#allocation5 + $0x18] sm:$0xff]  ;;  %v527_v41 = vmov 683565275   ;;  %v528_v43 = vmov 2475754826  }
  0x28   :  { %v43_v5 = vld [vmem:[#allocation2] sm:$0xff]  ;;  %v415_v6 = vpack.c.bf16 %v48_v4, %v47_v2  ;;  %v44_v7 = vld [vmem:[#allocation2 + $0x8] sm:$0xff]  ;;  %v529_v48 = vmov 2131351028   ;;  %v530_v51 = vmov 2102212464  }
  0x29   :  { %408 = vmatprep.mubr.msk.f32.mxu0 %vm56_vm0, %v43_v5  ;;  %412 = vmatprep.subr.bf16.mxu0 %v411_v3  ;;  %v383_v8 = vld [vmem:[%s711_s2] ss:$0 sm:$0xff]  ;;  %v531_v53 = vmov 920167782   ;;  %v532_v60 = vmov 1326507024  }
  0x2a   :  { %414 = vmatpush3.bf16.msra.mxu0 %v411_v3  ;;  %s533_s2 = smov 64   ;;  %s370_s12 = sshll.u32 %s534_s11, 4  ;;  %s371_s12 = int_to_ptr.vmem [resolvable:$true] %s370_s12 }
  0x2b   :  { %416 = vmatprep.subr.bf16.mxu0 %v415_v6  ;;  %s495_s13 = scalar_lea.vmem %s371_s12, 256  ;;  %p500_p3 = scmp.lt.s32.totalorder %s371_s12, %s371_s12 }
  0x2c   :  { %p496_p2 = scmp.ne.s32.totalorder %s371_s12, %s495_s13  ;;  %p501_p4 = scmp.lt.s32.totalorder %s495_s13, %s495_s13 }
  0x2e   :  { %418 = vmatpush3.bf16.msra.mxu0 %v415_v6  ;;  %p502_p5 = por %p501_p4, %p500_p3 }
  0x30   :  { %p503_p6 = pnand %p502_p5, %p496_p2 }
  0x31   :  { %409 = vmatmul.mubr.msk.f32.vlgmr.msra.gmra.mrb[0].mxu0 %vm56_vm0, %v44_v7 }
 0x104   :  { %v410_v9 = vpop.f32.mrb[0].mxu0 }
 0x105   :  { %v588_v10 = vadd.f32 %v410_v9, %v383_v8  ;;  %v129_v11 = vpop.f32.mrb[1].mxu0 }
 0x106   :  { %v590_v12 = vadd.f32 %v383_v8, %v129_v11 }
 0x107   :  { %v244_v13 = vand.u32 2139095040, %v588_v10  ;;  %v345_v14 = vmul.f32 %v588_v10, %v588_v10  ;;  %v241_v23 = vand.u32 2147483647, %v588_v10 }
 0x108   :  { %v141_v15 = vand.u32 2139095040, %v590_v12  ;;  %v344_v16 = vmul.f32 %v590_v12, %v590_v12  ;;  %v138_v17 = vand.u32 2147483647, %v590_v12  ;;  %vm140_vm13 = vcmp.lt.s32.totalorder %v590_v12, 0 }
 0x109   :  { %v245_v18 = vshrl.u32 %v244_v13, 23  ;;  %v347_v19 = vsub.f32 0.0, %v345_v14  ;;  %v604_v31 = vand.u32 8388607, %v241_v23 }
 0x10a   :  { %v142_v20 = vshrl.u32 %v141_v15, 23  ;;  %v346_v21 = vsub.f32 0.0, %v344_v16  ;;  %v145_v22 = vand.u32 8388607, %v138_v17  ;;  %vm673_vm14 = vcmp.le.f32.partialorder %v138_v17, 0.7853982 }
 0x10b   :  { %v390_v24 = vadd.s32 4294967169, %v245_v18  ;;  %v350_v28 = vmul.f32 1.442695, %v347_v19  ;;  %v249_v38 = vor.u32 8388608, %v604_v31 }
 0x10c   :  { %v386_v25 = vadd.s32 4294967169, %v142_v20  ;;  %v348_v26 = vmul.f32 1.442695, %v346_v21  ;;  %v146_v30 = vor.u32 8388608, %v145_v22 }
 0x10d   :  { %v251_v27 = vadd.s32 1, %v390_v24 }
 0x10e   :  { %v148_v29 = vadd.s32 1, %v386_v25  ;;  %439 = vpow2.f32 %v348_v26  ;;  %v608_v37 = vshll.u32 %v146_v30, 8 }
 0x10f   :  { %vm252_vm1 = vcmp.gt.s32.totalorder %v251_v27, 0  ;;  %441 = vpow2.f32 %v350_v28 }
 0x110   :  { %v253_v32 = vsel %vm252_vm1, %v251_v27, 0  ;;  %vm149_vm2 = vcmp.gt.s32.totalorder %v148_v29, 0 }
 0x111   :  { %v606_v33 = vand.u32 31, %v253_v32  ;;  %v150_v34 = vsel %vm149_vm2, %v148_v29, 0  ;;  %v611_v39 = vshrl.u32 %v253_v32, 5 }
 0x112   :  { %v151_v35 = vshrl.u32 %v150_v34, 5  ;;  %v152_v36 = vand.u32 31, %v150_v34 }
 0x113   :  { %v614_v40 = vsub.s32 32, %v606_v33  ;;  %v258_v42 = vshll.u32 %v527_v41, %v606_v33  ;;  %v261_v44 = vshll.u32 %v528_v43, %v606_v33  ;;  %v264_v49 = vshll.u32 %v529_v48, %v606_v33 }
 0x114   :  { %v153_v45 = vsub.s32 32, %v152_v36  ;;  %v155_v46 = vshll.u32 %v527_v41, %v152_v36  ;;  %v158_v47 = vshll.u32 %v528_v43, %v152_v36  ;;  %v161_v50 = vshll.u32 %v529_v48, %v152_v36 }
 0x115   :  { %v164_v52 = vshll.u32 %v530_v51, %v152_v36  ;;  %v167_v54 = vshll.u32 %v531_v53, %v152_v36  ;;  %vm170_vm3 = vcmp.lt.s32.totalorder %v151_v35, 1  ;;  %vm171_vm4 = vcmp.lt.s32.totalorder %v151_v35, 2 }
 0x116   :  { %v156_v55 = vshrl.u32 %v528_v43, %v153_v45  ;;  %v159_v56 = vshrl.u32 %v529_v48, %v153_v45  ;;  %v162_v57 = vshrl.u32 %v530_v51, %v153_v45  ;;  %v154_v58 = vshrl.u32 %v527_v41, %v153_v45 }
 0x117   :  { %v165_v59 = vshrl.u32 %v531_v53, %v153_v45  ;;  %v168_v61 = vshrl.u32 %v532_v60, %v153_v45  ;;  %vm172_vm5 = vcmp.lt.s32.totalorder %v151_v35, 3  ;;  %vm173_vm6 = vcmp.lt.s32.totalorder %v151_v35, 4 }
 0x118   :  { %v440_v62 = vpop.eup %439  ;;  %v157_v63 = vor.u32 %v156_v55, %v155_v46  ;;  %v160_v0 = vor.u32 %v159_v56, %v158_v47  ;;  %v163_v1 = vor.u32 %v162_v57, %v161_v50  ;;  %v259_v4 = vshrl.u32 %v528_v43, %v614_v40 }
 0x119   :  { %354 = vrot.lane.b32.xlu0 %v440_v62, %s533_s2  ;;  %v166_v2 = vor.u32 %v165_v59, %v164_v52  ;;  %v169_v3 = vor.u32 %v168_v61, %v167_v54  ;;  %v262_v5 = vshrl.u32 %v529_v48, %v614_v40  ;;  %v442_v11 = vpop.eup %441  ;;  %v265_v26 = vshrl.u32 %v530_v51, %v614_v40 }
 0x11a   :  { %v174_v6 = vsel %vm170_vm3, %v154_v58, %v157_v63  ;;  %v175_v7 = vsel %vm173_vm6, %v163_v1, 2102212464  ;;  %v178_v8 = vsel %vm170_vm3, %v157_v63, %v160_v0  ;;  %v182_v9 = vsel %vm170_vm3, %v160_v0, %v163_v1 }
 0x11b   :  { %v176_v13 = vsel %vm172_vm5, %v160_v0, %v175_v7  ;;  %v179_v14 = vsel %vm173_vm6, %v166_v2, 920167782  ;;  %v183_v15 = vsel %vm173_vm6, %v169_v3, 1326507024  ;;  %v260_v16 = vor.u32 %v259_v4, %v258_v42 }
 0x11c   :  { %v177_v18 = vsel %vm171_vm4, %v174_v6, %v176_v13  ;;  %v180_v19 = vsel %vm172_vm5, %v163_v1, %v179_v14  ;;  %v184_v20 = vsel %vm172_vm5, %v166_v2, %v183_v15  ;;  %v263_v21 = vor.u32 %v262_v5, %v261_v44 }
 0x11d   :  { %356 = vrot.lane.b32.xlu0 %v442_v11, %s533_s2  ;;  %v181_v22 = vsel %vm171_vm4, %v178_v8, %v180_v19  ;;  %v185_v24 = vsel %vm171_vm4, %v182_v9, %v184_v20  ;;  %v193_v25 = vmul.u32 %v608_v37, %v177_v18  ;;  %v266_v31 = vor.u32 %v265_v26, %v264_v49 }
 0x11e   :  { %v633_v27 = vmul.u32.u64.low %v608_v37, %v185_v24  ;;  %v634_v28 = vmul.u32.u64.high %v608_v37, %v185_v24, %v633_v27  ;;  %v637_v29 = vmul.u32.u64.low %v608_v37, %v181_v22  ;;  %v638_v30 = vmul.u32.u64.high %v608_v37, %v181_v22, %v637_v29 }
 0x11f   :  { %v267_v32 = vshll.u32 %v530_v51, %v606_v33  ;;  %v268_v34 = vshrl.u32 %v531_v53, %v614_v40  ;;  %v289_v36 = vshll.u32 %v249_v38, 8  ;;  %v257_v35 = vshrl.u32 %v527_v41, %v614_v40 }
 0x120   :  { %v270_v42 = vshll.u32 %v531_v53, %v606_v33  ;;  %v271_v43 = vshrl.u32 %v532_v60, %v614_v40  ;;  %vm273_vm7 = vcmp.lt.s32.totalorder %v611_v39, 1  ;;  %vm274_vm8 = vcmp.lt.s32.totalorder %v611_v39, 2 }
 0x121   :  { %v269_v44 = vor.u32 %v268_v34, %v267_v32  ;;  %vm276_vm9 = vcmp.lt.s32.totalorder %v611_v39, 4  ;;  %v281_v37 = vsel %vm273_vm7, %v260_v16, %v263_v21  ;;  %v194_v45 = vadd.s32 %v637_v29, %v634_v28 }
 0x122   :  { %vm195_vm10 = vc.u32 %v634_v28, %v637_v29  ;;  %v196_v38 = vadd.s32 1, %v638_v30  ;;  %v272_v46 = vor.u32 %v271_v43, %v270_v42  ;;  %vm275_vm11 = vcmp.lt.s32.totalorder %v611_v39, 3 }
 0x123   :  { %v278_v33 = vsel %vm276_vm9, %v266_v31, 2102212464  ;;  %v282_v41 = vsel %vm276_vm9, %v269_v44, 920167782  ;;  %v285_v40 = vsel %vm273_vm7, %v263_v21, %v266_v31  ;;  %v277_v48 = vsel %vm273_vm7, %v257_v35, %v260_v16 }
 0x124   :  { %v197_v47 = vsel %vm195_vm10, %v196_v38, %v638_v30  ;;  %v283_v49 = vsel %vm275_vm11, %v266_v31, %v282_v41  ;;  %v286_v50 = vsel %vm276_vm9, %v272_v46, 1326507024  ;;  %v279_v52 = vsel %vm275_vm11, %v263_v21, %v278_v33 }
 0x125   :  { %v198_v51 = vadd.s32 %v197_v47, %v193_v25  ;;  %v284_v53 = vsel %vm274_vm8, %v281_v37, %v283_v49  ;;  %v287_v54 = vsel %vm275_vm11, %v269_v44, %v286_v50  ;;  %v280_v61 = vsel %vm274_vm8, %v277_v48, %v279_v52 }
 0x126   :  { %v288_v55 = vsel %vm274_vm8, %v285_v40, %v287_v54  ;;  %v657_v56 = vmul.u32.u64.low %v289_v36, %v284_v53  ;;  %v658_v57 = vmul.u32.u64.high %v289_v36, %v284_v53, %v657_v56  ;;  %v296_v2 = vmul.u32 %v289_v36, %v280_v61 }
 0x127   :  { %v199_v58 = vadd.s32 536870912, %v198_v51  ;;  %v661_v59 = vmul.u32.u64.low %v289_v36, %v288_v55  ;;  %v662_v60 = vmul.u32.u64.high %v289_v36, %v288_v55, %v661_v59  ;;  %vm230_vm4 = vweird.f32 %v590_v12 }
 0x128   :  { %v299_v63 = vadd.s32 1, %v658_v57  ;;  %vm243_vm5 = vcmp.lt.s32.totalorder %v588_v10, 0  ;;  %vm242_vm6 = vcmp.le.f32.partialorder %v241_v23, 0.7853982  ;;  %vm362_vm10 = vcmask 523264  }
 0x129   :  { %v200_v62 = vshrl.u32 %v199_v58, 30  ;;  %vm298_vm12 = vc.u32 %v662_v60, %v657_v56  ;;  %v297_v52 = vadd.s32 %v657_v56, %v662_v60  ;;  %vm333_vm11 = vweird.f32 %v588_v10 }
 0x12a   :  { %v300_v3 = vsel %vm298_vm12, %v299_v63, %v658_v57 }
 0x12b   :  { %v201_v0 = vshll.u32 %v200_v62, 30  ;;  %v224_v1 = vsub.s32 4, %v200_v62  ;;  %v301_v6 = vadd.s32 %v300_v3, %v296_v2 }
 0x12d   :  { %v202_v39 = vsub.s32 %v198_v51, %v201_v0  ;;  %v225_v5 = vsel %vm140_vm13, %v224_v1, %v200_v62  ;;  %v302_v9 = vadd.s32 536870912, %v301_v6 }
 0x12e   :  { %v227_v7 = vsel %vm673_vm14, 0, %v225_v5 }
 0x12f   :  { %v204_v8 = vsub.s32 0, %v202_v39  ;;  %v303_v14 = vshrl.u32 %v302_v9, 30  ;;  %v231_v44 = vand.u32 3, %v227_v7 }
 0x131   :  { %v387_v11 = vmin.u32 %v204_v8, %v202_v39  ;;  %v304_v16 = vshll.u32 %v303_v14, 30  ;;  %vm236_vm1 = vcmp.eq.s32.totalorder %v231_v44, 2  ;;  %vm233_vm2 = vcmp.eq.s32.totalorder %v231_v44, 0 }
 0x132   :  { %vm232_vm3 = vcmp.lt.s32.totalorder %v231_v44, 2  ;;  %v327_v56 = vsub.s32 4, %v303_v14 }
 0x133   :  { %v206_v13 = vclz %v387_v11  ;;  %v305_v24 = vsub.s32 %v301_v6, %v304_v16 }
 0x134   :  { %v328_v60 = vsel %vm243_vm5, %v327_v56, %v303_v14 }
 0x135   :  { %v388_v15 = vadd.s32 4294967294, %v206_v13  ;;  %v307_v28 = vsub.s32 0, %v305_v24  ;;  %v330_v2 = vsel %vm242_vm6, 0, %v328_v60 }
 0x136   :  { %v334_v4 = vand.u32 3, %v330_v2 }
 0x137   :  { %vm389_vm15 = vcmp.lt.s32.totalorder %v388_v15, 0  ;;  %v391_v32 = vmin.u32 %v307_v28, %v305_v24 }
 0x138   :  { %v209_v17 = vsel %vm389_vm15, 0, %v388_v15  ;;  %vm336_vm7 = vcmp.eq.s32.totalorder %v334_v4, 0  ;;  %vm339_vm8 = vcmp.eq.s32.totalorder %v334_v4, 2  ;;  %vm335_vm9 = vcmp.lt.s32.totalorder %v334_v4, 2 }
 0x139   :  { %v210_v18 = vsub.s32 32, %v209_v17  ;;  %v214_v19 = vsub.s32 4294967266, %v209_v17  ;;  %v211_v20 = vshll.u32 %v202_v39, %v209_v17  ;;  %v309_v35 = vclz %v391_v32 }
 0x13b   :  { %v212_v21 = vshrl.u32 %v194_v45, %v210_v18  ;;  %v215_v22 = vadd.s32 127, %v214_v19  ;;  %v392_v43 = vadd.s32 4294967294, %v309_v35 }
 0x13d   :  { %v213_v25 = vor.u32 %v212_v21, %v211_v20  ;;  %v216_v26 = vshll.u32 %v215_v22, 23  ;;  %vm393_vm0 = vcmp.lt.s32.totalorder %v392_v43, 0 }
 0x13e   :  { %v312_v37 = vsel %vm393_vm0, 0, %v392_v43 }
 0x13f   :  { %v217_v27 = vor.u32 4788187, %v216_v26  ;;  %v220_v30 = vcvt.s32.f32 %v213_v25  ;;  %v317_v41 = vsub.s32 4294967266, %v312_v37  ;;  %v313_v51 = vsub.s32 32, %v312_v37 }
 0x140   :  { %v314_v55 = vshll.u32 %v305_v24, %v312_v37 }
 0x141   :  { %v218_v29 = vand.u32 2147483647, %v217_v27  ;;  %v318_v50 = vadd.s32 127, %v317_v41  ;;  %v315_v54 = vshrl.u32 %v297_v52, %v313_v51 }
 0x143   :  { %v221_v31 = vmul.f32 %v220_v30, %v218_v29  ;;  %v319_v53 = vshll.u32 %v318_v50, 23  ;;  %v316_v58 = vor.u32 %v315_v54, %v314_v55 }
 0x145   :  { %v222_v34 = vxor.u32 2147483648, %v221_v31  ;;  %v320_v57 = vor.u32 4788187, %v319_v53  ;;  %v323_v61 = vcvt.s32.f32 %v316_v58 }
 0x147   :  { %v223_v36 = vsel %vm140_vm13, %v222_v34, %v221_v31  ;;  %v321_v59 = vand.u32 2147483647, %v320_v57 }
 0x148   :  { %v226_v42 = vsel %vm673_vm14, %v590_v12, %v223_v36 }
 0x149   :  { %443 = vcosq.f32 %v226_v42  ;;  %v324_v62 = vmul.f32 %v323_v61, %v321_v59 }
 0x14a   :  { %445 = vsinq.f32 %v226_v42 }
 0x14b   :  { %v325_v63 = vxor.u32 2147483648, %v324_v62 }
 0x14d   :  { %v326_v0 = vsel %vm243_vm5, %v325_v63, %v324_v62 }
 0x14e   :  { %v329_v12 = vsel %vm242_vm6, %v588_v10, %v326_v0 }
 0x14f   :  { %447 = vcosq.f32 %v329_v12 }
 0x150   :  { %449 = vsinq.f32 %v329_v12 }
 0x153   :  { %v444_v45 = vpop.eup %443 }
 0x154   :  { %v446_v38 = vpop.eup %445  ;;  %v237_v46 = vxor.u32 2147483648, %v444_v45 }
 0x155   :  { %v234_v33 = vxor.u32 2147483648, %v446_v38 }
 0x156   :  { %v238_v40 = vsel %vm236_vm1, %v237_v46, %v446_v38 }
 0x157   :  { %v235_v47 = vsel %vm233_vm2, %v444_v45, %v234_v33 }
 0x158   :  { %v239_v48 = vsel %vm232_vm3, %v235_v47, %v238_v40 }
 0x159   :  { %v240_v49 = vsel %vm230_vm4, nan, %v239_v48  ;;  %v448_v1 = vpop.eup %447 }
 0x15a   :  { %v450_v3 = vpop.eup %449  ;;  %v340_v5 = vxor.u32 2147483648, %v448_v1 }
 0x15b   :  { %v337_v39 = vxor.u32 2147483648, %v450_v3 }
 0x15c   :  { %v341_v7 = vsel %vm339_vm8, %v340_v5, %v450_v3 }
 0x15d   :  { %v338_v6 = vsel %vm336_vm7, %v448_v1, %v337_v39 }
 0x15e   :  { %v342_v9 = vsel %vm335_vm9, %v338_v6, %v341_v7 }
 0x15f   :  { %v343_v11 = vsel %vm333_vm11, nan, %v342_v9 }
 0x18b   :  { %v355_v8 = vpop.permute.xlu0 %354 }
 0x18c   :  { %v360_v23 = vmul.f32 %v355_v8, %v240_v49 }
 0x18e   :  { %363 = vst.msk [vmem:[#allocation7] sm:$0xff] %vm362_vm10, %v360_v23 }
 0x18f   :  { %v357_v13 = vpop.permute.xlu0 %356 }
 0x190   :  { %v361_v14 = vmul.f32 %v357_v13, %v343_v11 }
 0x192   :  { %364 = vst.msk [vmem:[#allocation7 + $0x8] sm:$0xff] %vm362_vm10, %v361_v14 }
 0x193   :  { %506 = shalt.err (!%p503_p6)
}
 0x194   :  { %s507_s16 = scalar_lea.hbm %s712_s3, 256 }
 0x195   :  { %p508_p7 = scmp.ne.s32.totalorder %s712_s3, %s507_s16  ;;  %p511_p8 = scmp.lt.u32.totalorder %s507_s16, %s712_s3 }
 0x197   :  { %p513_p9 = pnand %p511_p8, %p508_p7 }
 0x199   :  { %516 = shalt.err (!%p513_p9)
}
 0x19a   :  { %376 = dma.vmem_to_hbm [thread:$0]  %s371_s12, 256, %s712_s3, [#allocation4], %s524_s22, %s524_s22, %s525_s23  }
 0x19b   :  { %521 = dma.done.wait [#allocation4], 256  }
 0x19c   :  { %522 = vsyncadd [#allocation4], 4294967040 }
 0x19d   :  { %380 = vsyncpa [#allocation3], 1 }
 0x19e   :  { %381 = vsyncpa [#allocation6], 1 }
 0x19f   :  { %382 = vsyncpa [#allocation4], 1 }

</bundles_post_ra>
